<compile_context>
chip_gen: v7x
topology: tpu7x:2x2x1
jax: 0.10.0
libtpu: 0.0.40
codegen_flags: <defaults>
</compile_context>

<pallas_src>
import jax
import jax.numpy as jnp
from jax.experimental import pallas as pl
from jax.experimental.pallas import tpu as pltpu


def _round_up(v, m):
    return (v + m - 1) // m * m


def _patch_embed_kernel(x_ref, w_ref, b_ref, o_ref):
    # x_ref: (TM, K) streamed patch rows; w_ref: (K, D) resident; b_ref: (1, D) f32 resident.
    acc = jnp.dot(x_ref[...], w_ref[...], preferred_element_type=jnp.float32)
    o_ref[...] = (acc + b_ref[...]).astype(o_ref.dtype)


def patch_embed(x, weight, bias, patch_size, *, block_m=256):
    """ViT patch embedding.

    x:      [B, C, H, W]   (NCHW, like PyTorch)
    weight: [dim, C, p, p] (Conv2d weight, OIHW)
    bias:   [dim]
    returns [B, (H//p)*(W//p), dim]
    """
    B, C, H, W = x.shape
    dim = weight.shape[0]
    p = patch_size
    assert H % p == 0 and W % p == 0
    hp, wp = H // p, W // p
    n_patches = hp * wp

    # --- layout glue: non-overlapping patch extraction (no compute) ---
    # TODO(synk): fuse this relayout into the kernel (grid over (B, hp) with an
    # in-kernel (C, p, W) -> (wp, C*p*p) reshuffle) so x streams HBM->VMEM once
    # instead of paying an extra HBM round trip for the transpose.
    x_patches = (
        x.reshape(B, C, hp, p, wp, p)
        .transpose(0, 2, 4, 1, 3, 5)
        .reshape(B * n_patches, C * p * p)
    )

    # conv weight [dim, C, p, p] -> dense weight [C*p*p, dim], in compute dtype
    w_mat = weight.reshape(dim, C * p * p).T.astype(x.dtype)
    # bias: pre-cast to f32 once (kernel adds it to the f32 accumulator)
    b_mat = bias.astype(jnp.float32).reshape(1, dim)

    M, K = x_patches.shape
    out_dtype = x.dtype

    # --- pad to TPU-friendly tiles ---
    # lane dim (last axis of every block) -> multiple of 128 for dense stores;
    # sublane multiple depends on element width (8 f32 / 16 bf16 / 32 int8).
    x_it = jnp.dtype(x_patches.dtype).itemsize
    sub = {4: 8, 2: 16, 1: 32}.get(x_it, 8)
    K_pad = _round_up(K, 128)
    D_pad = _round_up(dim, 128)
    tm = _round_up(max(sub, min(block_m, _round_up(M, sub))), sub)
    M_pad = _round_up(M, tm)

    if K_pad != K or M_pad != M:
        x_patches = jnp.pad(x_patches, ((0, M_pad - M), (0, K_pad - K)))
    if K_pad != K or D_pad != dim:
        w_mat = jnp.pad(w_mat, ((0, K_pad - K), (0, D_pad - dim)))
    if D_pad != dim:
        b_mat = jnp.pad(b_mat, ((0, 0), (0, D_pad - dim)))

    grid = (M_pad // tm,)

    # explicit VMEM budget: double-buffered x/out tiles + resident W/bias,
    # capped at 64 MiB so the same code is safe on v7x (half the VMEM of v6e).
    w_it = jnp.dtype(w_mat.dtype).itemsize
    o_it = jnp.dtype(out_dtype).itemsize
    vmem_need = (
        2 * tm * K_pad * x_it       # double-buffered activation tile
        + 2 * tm * D_pad * o_it     # double-buffered output tile
        + 2 * K_pad * D_pad * w_it  # resident weight (counted 2x conservatively)
        + 2 * D_pad * 4             # resident bias (f32)
    )
    vmem_limit = int(min(64 * 1024 * 1024, max(16 * 1024 * 1024, 2 * vmem_need)))

    cost = pl.CostEstimate(
        flops=2 * M_pad * K_pad * D_pad,
        bytes_accessed=(
            M_pad * K_pad * x_it
            + K_pad * D_pad * w_it
            + M_pad * D_pad * o_it
            + D_pad * 4
        ),
        transcendentals=0,
    )

    out = pl.pallas_call(
        _patch_embed_kernel,
        out_shape=jax.ShapeDtypeStruct((M_pad, D_pad), out_dtype),
        grid_spec=pltpu.PrefetchScalarGridSpec(
            num_scalar_prefetch=0,
            grid=grid,
            in_specs=[
                pl.BlockSpec((tm, K_pad), lambda i: (i, 0)),     # streamed over M
                pl.BlockSpec((K_pad, D_pad), lambda i: (0, 0)),  # resident weight
                pl.BlockSpec((1, D_pad), lambda i: (0, 0)),      # resident bias
            ],
            out_specs=pl.BlockSpec((tm, D_pad), lambda i: (i, 0)),
        ),
        compiler_params=pltpu.CompilerParams(
            dimension_semantics=("parallel",),   # v7x: shard M across both TCs
            vmem_limit_bytes=vmem_limit,
        ),
        cost_estimate=cost,
    )(x_patches, w_mat, b_mat)

    # strip padding, restore [B, N, dim]  == rearrange 'b e h w -> b (h w) e'
    return out[:M, :dim].reshape(B, n_patches, dim)


def patch_embed_ref(x, weight, bias, patch_size):
    """Pure-JAX reference (equivalent to the PyTorch forward)."""
    out = jax.lax.conv_general_dilated(
        x, weight,
        window_strides=(patch_size, patch_size),
        padding="VALID",
        dimension_numbers=("NCHW", "OIHW", "NCHW"),
    ) + bias[None, :, None, None].astype(x.dtype)
    B, E, Hh, Ww = out.shape
    return out.reshape(B, E, Hh * Ww).transpose(0, 2, 1)


if __name__ == "__main__":
    # Small shapes consistent with the module: batch=2, channels=4, 16x16 image,
    # patch_size=8 (-> 4 patches per image), embedding dim=32.
    B, C, H, W = 2, 4, 16, 16
    patch_size = 8
    dim = 32

    key = jax.random.PRNGKey(0)
    kx, kw, kb = jax.random.split(key, 3)
    x = jax.random.normal(kx, (B, C, H, W), dtype=jnp.float32)
    weight = jax.random.normal(kw, (dim, C, patch_size, patch_size), dtype=jnp.float32) * 0.02
    bias = jax.random.normal(kb, (dim,), dtype=jnp.float32) * 0.02

    n_patches = (H // patch_size) * (W // patch_size)

    # f32 path: tight check against the conv reference.
    out = jax.block_until_ready(patch_embed(x, weight, bias, patch_size))
    ref = patch_embed_ref(x, weight, bias, patch_size)
    assert out.shape == (B, n_patches, dim), out.shape
    assert jnp.allclose(out, ref, atol=1e-4, rtol=1e-4), float(jnp.max(jnp.abs(out - ref)))

    # bf16 path (the MXU-peak configuration on v6e/v7x): looser tolerance.
    xb = x.astype(jnp.bfloat16)
    wb = weight.astype(jnp.bfloat16)
    out_bf16 = jax.block_until_ready(patch_embed(xb, wb, bias, patch_size))
    ref_bf16 = patch_embed_ref(xb, wb, bias.astype(jnp.bfloat16), patch_size)
    assert out_bf16.shape == (B, n_patches, dim), out_bf16.shape
    assert jnp.allclose(out_bf16.astype(jnp.float32), ref_bf16.astype(jnp.float32),
                        atol=5e-2, rtol=5e-2)

    print("KERNEL_OK")
</pallas_src>

<mosaic_0001>
module attributes {stable_mosaic.version = 11 : i64} {
  func.func @_patch_embed_kernel(%arg0: i32, %arg1: memref<8x256xf32, #tpu.memory_space<vmem>>, %arg2: memref<256x128xf32, #tpu.memory_space<vmem>>, %arg3: memref<1x128xf32, #tpu.memory_space<vmem>>, %arg4: memref<8x128xf32, #tpu.memory_space<vmem>>) attributes {dimension_semantics = [#tpu.dimension_semantics<parallel>], iteration_bounds = array<i64: 1>, scalar_prefetch = 0 : i64, scratch_operands = 0 : i64, tpu.core_type = #tpu.core_type<tc>, window_params = [{transform_indices = @transform_0, window_bounds = array<i64: 8, 256>}, {pipeline_mode = #tpu.pipeline_mode<synchronous>, transform_indices = @transform_1, window_bounds = array<i64: 256, 128>}, {pipeline_mode = #tpu.pipeline_mode<synchronous>, transform_indices = @transform_2, window_bounds = array<i64: 1, 128>}, {transform_indices = @transform_3, window_bounds = array<i64: 8, 128>}]} {
    %c0 = arith.constant 0 : index
    %c0_0 = arith.constant 0 : index
    %0 = vector.load %arg1[%c0, %c0_0] : memref<8x256xf32, #tpu.memory_space<vmem>>, vector<8x256xf32>
    %c0_1 = arith.constant 0 : index
    %c0_2 = arith.constant 0 : index
    %1 = vector.load %arg2[%c0_1, %c0_2] : memref<256x128xf32, #tpu.memory_space<vmem>>, vector<256x128xf32>
    %cst = arith.constant dense<0.000000e+00> : vector<8x128xf32>
    %2 = tpu.matmul %0, %1, %cst {dimension_numbers = #tpu.dot_dimension_numbers<[1], [0], [0], [1], [0, 0, 1, 1], [], []>} : vector<8x256xf32>, vector<256x128xf32>, vector<8x128xf32> -> vector<8x128xf32>
    %c0_3 = arith.constant 0 : index
    %c0_4 = arith.constant 0 : index
    %3 = vector.load %arg3[%c0_3, %c0_4] : memref<1x128xf32, #tpu.memory_space<vmem>>, vector<1x128xf32>
    %4 = vector.broadcast %3 : vector<1x128xf32> to vector<8x128xf32>
    %5 = arith.addf %2, %4 : vector<8x128xf32>
    %c0_5 = arith.constant 0 : index
    %c0_6 = arith.constant 0 : index
    %6 = vector.load %arg4[%c0_5, %c0_6] : memref<8x128xf32, #tpu.memory_space<vmem>>, vector<8x128xf32>
    tpu.vector_store %arg4[%c0_5, %c0_6], %5 {strides = array<i32>} : memref<8x128xf32, #tpu.memory_space<vmem>>, vector<8x128xf32>,
    return
  }
  func.func @transform_0(%arg0: i32) -> (i32, i32) {
    %c0_i32 = arith.constant 0 : i32
    %c0_i32_0 = arith.constant 0 : i32
    return %arg0, %c0_i32 : i32, i32
  }
  func.func @transform_1(%arg0: i32) -> (i32, i32) {
    %c0_i32 = arith.constant 0 : i32
    %c0_i32_0 = arith.constant 0 : i32
    %c0_i32_1 = arith.constant 0 : i32
    return %c0_i32, %c0_i32_0 : i32, i32
  }
  func.func @transform_2(%arg0: i32) -> (i32, i32) {
    %c0_i32 = arith.constant 0 : i32
    %c0_i32_0 = arith.constant 0 : i32
    %c0_i32_1 = arith.constant 0 : i32
    return %c0_i32, %c0_i32_0 : i32, i32
  }
  func.func @transform_3(%arg0: i32) -> (i32, i32) {
    %c0_i32 = arith.constant 0 : i32
    %c0_i32_0 = arith.constant 0 : i32
    return %arg0, %c0_i32 : i32, i32
  }
}

</mosaic_0001>

<bundles_post_ra>
// kernel: tpu_custom_call.1
= control target key start
LH: loop header
LB: loop body
LE: loop exit
PB: predicated region body
PF: predicated region fallthrough
CT: control target
= control target key end

     0   :  { %8 = vsyncpa [#allocation3], 0  ;;  %s385_s0 = inlined_call_operand.hbm [shape: f32[8,256], index: 0, kind: input, shape index: {}]   ;;  %s386_s1 = inlined_call_operand.hbm [shape: f32[256,128], index: 1, kind: input, shape index: {}]   ;;  %s387_s2 = inlined_call_operand.vmem [shape: f32[1,128], index: 2, kind: input, shape index: {}]   ;;  %s388_s3 = inlined_call_operand.hbm [shape: f32[8,128], index: 3, kind: output, shape index: {}]  }
   0x1   :  { %9 = vsyncpa [#allocation6], 0 }
   0x2   :  { %10 = vsyncpa [#allocation4], 0  ;;  %s314_s12 = smov [#allocation2]   ;;  %s315_s14 = smov [#allocation5]  }
   0x3   :  { %s17_s13 = sshll.u32 %s314_s12, 4  ;;  %s26_s15 = sshll.u32 %s315_s14, 4  ;;  %s18_s13 = int_to_ptr.vmem [resolvable:$true] %s17_s13  ;;  %s339_s15 = int_to_ptr.vmem [resolvable:$true] %s26_s15 }
   0x4   :  { %s242_s18 = scalar_lea.hbm %s385_s0, 256 }
   0x5   :  { %p243_p0 = scmp.ne.s32.totalorder %s385_s0, %s242_s18  ;;  %p246_p1 = scmp.lt.u32.totalorder %s242_s18, %s385_s0 }
   0x7   :  { %p248_p2 = pnand %p246_p1, %p243_p0 }
   0x9   :  { %251 = shalt.err (!%p248_p2)
}
   0xa   :  { %s252_s23 = scalar_lea.vmem %s18_s13, 256  ;;  %p257_p4 = scmp.lt.s32.totalorder %s18_s13, %s18_s13 }
   0xb   :  { %p253_p3 = scmp.ne.s32.totalorder %s18_s13, %s252_s23  ;;  %p258_p5 = scmp.lt.s32.totalorder %s252_s23, %s252_s23 }
   0xd   :  { %p259_p6 = por %p258_p5, %p257_p4 }
   0xf   :  { %p260_p7 = pnand %p259_p6, %p253_p3 }
  0x11   :  { %263 = shalt.err (!%p260_p7)
}
  0x12   :  { %20 = dma.hbm_to_vmem [thread:$0]  %s385_s0, 256, %s18_s13, [#allocation3]  }
  0x13   :  { %s264_s28 = scalar_lea.hbm %s386_s1, 4096 }
  0x14   :  { %p265_p8 = scmp.ne.s32.totalorder %s386_s1, %s264_s28  ;;  %p268_p9 = scmp.lt.u32.totalorder %s264_s28, %s386_s1 }
  0x16   :  { %p270_p10 = pnand %p268_p9, %p265_p8 }
  0x18   :  { %273 = shalt.err (!%p270_p10)
}
  0x19   :  { %s274_s6 = scalar_lea.vmem %s339_s15, 4096  ;;  %p279_p12 = scmp.lt.s32.totalorder %s339_s15, %s339_s15 }
  0x1a   :  { %p275_p11 = scmp.ne.s32.totalorder %s339_s15, %s274_s6  ;;  %p280_p13 = scmp.lt.s32.totalorder %s274_s6, %s274_s6 }
  0x1c   :  { %p281_p0 = por %p280_p13, %p279_p12 }
  0x1e   :  { %p282_p1 = pnand %p281_p0, %p275_p11 }
  0x20   :  { %285 = shalt.err (!%p282_p1)
}
  0x21   :  { %s316_s0 = smov 128   ;;  %s317_s7 = smov 8  }
  0x22   :  { %32 = dma.hbm_to_vmem [thread:$0]  %s386_s1, 4096, %s339_s15, [#allocation6], %s316_s0, %s316_s0, %s317_s7  }
  0x23   :  { %308 = dma.done.wait [#allocation3], 256  }
  0x24   :  { %309 = vsyncadd [#allocation3], 4294967040 }
  0x25   :  { %310 = dma.done.wait [#allocation6], 4096  }
  0x26   :  { %311 = vsyncadd [#allocation6], 4294963200  ;;  %v59_v0 = vld [vmem:[#allocation5 + $0x80] sm:$0xff]  ;;  %v60_v1 = vld [vmem:[#allocation5 + $0x88] sm:$0xff]  ;;  %s318_s11 = smov [#allocation7]  }
  0x27   :  { %v43_v2 = vld [vmem:[#allocation5] sm:$0xff]  ;;  %v205_v3 = vpack.c.bf16 %v60_v1, %v59_v0  ;;  %v44_v4 = vld [vmem:[#allocation5 + $0x8] sm:$0xff]  ;;  %v61_v5 = vld [vmem:[#allocation5 + $0x90] sm:$0xff]  ;;  %s159_s12 = sshll.u32 %s318_s11, 4  ;;  %s160_s12 = int_to_ptr.vmem [resolvable:$true] %s159_s12 }
  0x28   :  { %v62_v6 = vld [vmem:[#allocation5 + $0x98] sm:$0xff]  ;;  %v207_v7 = vpack.c.bf16 %v44_v4, %v43_v2  ;;  %v45_v9 = vld [vmem:[#allocation5 + $0x10] sm:$0xff]  ;;  %v63_v11 = vld [vmem:[#allocation5 + $0xa0] sm:$0xff]  ;;  %s286_s13 = scalar_lea.vmem %s160_s12, 128  ;;  %p291_p3 = scmp.lt.s32.totalorder %s160_s12, %s160_s12 }
  0x29   :  { %v209_v8 = vpack.c.bf16 %v62_v6, %v61_v5  ;;  %v46_v10 = vld [vmem:[#allocation5 + $0x18] sm:$0xff]  ;;  %206 = vmatprep.subr.bf16.mxu0 %v205_v3  ;;  %v64_v12 = vld [vmem:[#allocation5 + $0xa8] sm:$0xff]  ;;  %v47_v15 = vld [vmem:[#allocation5 + $0x20] sm:$0xff]  ;;  %p287_p2 = scmp.ne.s32.totalorder %s160_s12, %s286_s13  ;;  %p292_p4 = scmp.lt.s32.totalorder %s286_s13, %s286_s13 }
  0x2a   :  { %208 = vmatpush3.bf16.msra.mxu0 %v207_v7  ;;  %v211_v13 = vpack.c.bf16 %v46_v10, %v45_v9  ;;  %v213_v14 = vpack.c.bf16 %v64_v12, %v63_v11  ;;  %v48_v16 = vld [vmem:[#allocation5 + $0x28] sm:$0xff]  ;;  %v65_v17 = vld [vmem:[#allocation5 + $0xb0] sm:$0xff]  ;;  %v66_v18 = vld [vmem:[#allocation5 + $0xb8] sm:$0xff] }
  0x2b   :  { %210 = vmatprep.subr.bf16.mxu0 %v209_v8  ;;  %v215_v19 = vpack.c.bf16 %v48_v16, %v47_v15  ;;  %v217_v20 = vpack.c.bf16 %v66_v18, %v65_v17  ;;  %v49_v21 = vld [vmem:[#allocation5 + $0x30] sm:$0xff]  ;;  %v50_v22 = vld [vmem:[#allocation5 + $0x38] sm:$0xff]  ;;  %v67_v23 = vld [vmem:[#allocation5 + $0xc0] sm:$0xff]  ;;  %p293_p5 = por %p292_p4, %p291_p3 }
  0x2c   :  { %v68_v24 = vld [vmem:[#allocation5 + $0xc8] sm:$0xff]  ;;  %v42_v25 = vld [vmem:[#allocation2 + $0x8] sm:$0xff]  ;;  %v219_v26 = vpack.c.bf16 %v50_v22, %v49_v21  ;;  %v51_v28 = vld [vmem:[#allocation5 + $0x40] sm:$0xff] }
  0x2d   :  { %146 = vmatprep.mubr.f32.mxu0 %v42_v25  ;;  %v221_v27 = vpack.c.bf16 %v68_v24, %v67_v23  ;;  %v52_v29 = vld [vmem:[#allocation5 + $0x48] sm:$0xff]  ;;  %v69_v30 = vld [vmem:[#allocation5 + $0xd0] sm:$0xff]  ;;  %v70_v31 = vld [vmem:[#allocation5 + $0xd8] sm:$0xff]  ;;  %p294_p6 = pnand %p293_p5, %p287_p2 }
  0x2e   :  { %212 = vmatpush3.bf16.msra.mxu0 %v211_v13  ;;  %v223_v32 = vpack.c.bf16 %v52_v29, %v51_v28  ;;  %v225_v33 = vpack.c.bf16 %v70_v31, %v69_v30  ;;  %v53_v34 = vld [vmem:[#allocation5 + $0x50] sm:$0xff]  ;;  %v54_v35 = vld [vmem:[#allocation5 + $0x58] sm:$0xff]  ;;  %v71_v36 = vld [vmem:[#allocation5 + $0xe0] sm:$0xff] }
  0x2f   :  { %214 = vmatprep.subr.bf16.mxu0 %v213_v14  ;;  %v72_v37 = vld [vmem:[#allocation5 + $0xe8] sm:$0xff]  ;;  %v227_v38 = vpack.c.bf16 %v54_v35, %v53_v34  ;;  %v55_v40 = vld [vmem:[#allocation5 + $0x60] sm:$0xff]  ;;  %v73_v42 = vld [vmem:[#allocation5 + $0xf0] sm:$0xff] }
  0x30   :  { %v229_v39 = vpack.c.bf16 %v72_v37, %v71_v36  ;;  %v56_v41 = vld [vmem:[#allocation5 + $0x68] sm:$0xff]  ;;  %v74_v43 = vld [vmem:[#allocation5 + $0xf8] sm:$0xff]  ;;  %v57_v46 = vld [vmem:[#allocation5 + $0x70] sm:$0xff] }
  0x31   :  { %v231_v44 = vpack.c.bf16 %v56_v41, %v55_v40  ;;  %v233_v45 = vpack.c.bf16 %v74_v43, %v73_v42  ;;  %v58_v47 = vld [vmem:[#allocation5 + $0x78] sm:$0xff]  ;;  %v41_v49 = vld [vmem:[#allocation2] sm:$0xff] }
  0x32   :  { %216 = vmatpush3.bf16.msra.mxu0 %v215_v19  ;;  %v235_v48 = vpack.c.bf16 %v58_v47, %v57_v46  ;;  %v169_v51 = vld [vmem:[%s387_s2] ss:$0 sm:$0xff] }
  0x33   :  { %218 = vmatprep.subr.bf16.mxu0 %v217_v20 }
  0x36   :  { %220 = vmatpush3.bf16.msra.mxu0 %v219_v26 }
  0x37   :  { %222 = vmatprep.subr.bf16.mxu0 %v221_v27 }
  0x3a   :  { %224 = vmatpush3.bf16.msra.mxu0 %v223_v32 }
  0x3b   :  { %226 = vmatprep.subr.bf16.mxu0 %v225_v33 }
  0x3e   :  { %228 = vmatpush3.bf16.msra.mxu0 %v227_v38 }
  0x3f   :  { %230 = vmatprep.subr.bf16.mxu0 %v229_v39 }
  0x42   :  { %232 = vmatpush3.bf16.msra.mxu0 %v231_v44 }
  0x43   :  { %234 = vmatprep.subr.bf16.mxu0 %v233_v45 }
  0x46   :  { %236 = vmatpush3.bf16.msra.mxu0 %v235_v48 }
  0x49   :  { %147 = vmatmul.mubr.f32.vlgmr.msra.gmra.mrb[0].mxu0 %v41_v49 }
 0x11c   :  { %v202_v50 = vpop.f32.mrb[0].mxu0 }
 0x11d   :  { %v203_v52 = vpop.f32.mrb[1].mxu0 }
 0x11e   :  { %v204_v53 = vadd.f32 %v203_v52, %v202_v50 }
 0x120   :  { %v149_v54 = vadd.f32 %v204_v53, %v169_v51 }
 0x122   :  { %152 = vst [vmem:[#allocation7] sm:$0xff] %v149_v54 }
 0x123   :  { %297 = shalt.err (!%p294_p6)
}
 0x124   :  { %s298_s16 = scalar_lea.hbm %s388_s3, 128 }
 0x125   :  { %p299_p7 = scmp.ne.s32.totalorder %s388_s3, %s298_s16  ;;  %p302_p8 = scmp.lt.u32.totalorder %s298_s16, %s388_s3 }
 0x127   :  { %p304_p9 = pnand %p302_p8, %p299_p7 }
 0x129   :  { %307 = shalt.err (!%p304_p9)
}
 0x12a   :  { %162 = dma.vmem_to_hbm [thread:$0]  %s160_s12, 128, %s388_s3, [#allocation4]  }
 0x12b   :  { %312 = dma.done.wait [#allocation4], 128  }
 0x12c   :  { %313 = vsyncadd [#allocation4], 4294967168 }
 0x12d   :  { %166 = vsyncpa [#allocation3], 1 }
 0x12e   :  { %167 = vsyncpa [#allocation6], 1 }
 0x12f   :  { %168 = vsyncpa [#allocation4], 1 }

</bundles_post_ra>
